<compile_context>
chip_gen: v6e
topology: v6e:2x2x1
jax: 0.10.0
libtpu: 0.0.40
codegen_flags: <defaults>
</compile_context>

<pallas_src>
import functools

import jax
import jax.numpy as jnp
from jax.experimental import pallas as pl
from jax.experimental.pallas import tpu as pltpu


def _conv_bn_silu_kernel(x_ref, w_ref, b_ref, m_ref, o_ref, *,
                         kh, kw, pad, ext, width, silu):
    # x_ref: (1, Cin, H*W)      one batch element, channel-major, spatial on lanes
    # w_ref: (Cout, KH*KW*Cin)  BN-scale-folded weights, K ordered (tap_i, tap_j, cin)
    # b_ref: (Cout, 1)          folded BN bias (f32)
    # m_ref: (KW, H*W)          column-validity mask per horizontal tap offset
    # o_ref: (1, Cout, H*W)     lane-dense output tile
    cin, hw = x_ref.shape[1], x_ref.shape[2]

    x = x_ref[0]                                            # (Cin, H*W)
    if ext:
        # Zero halo for 'same' padding, built in VMEM (128-aligned lane concat)
        # instead of a jnp.pad HBM pass in the wrapper.
        z = jnp.zeros((cin, ext), x.dtype)
        x = jnp.concatenate([z, x, z], axis=1)              # (Cin, H*W + 2*ext)

    # im2col over the KH*KW taps: each tap is a static lane-shift of the
    # flattened plane; out-of-row reads land in the zero halo, row-wrapped
    # columns are killed by the precomputed mask.  One concat, zero reshapes.
    taps = []
    for i in range(kh):
        for j in range(kw):
            delta = (i - pad) * width + (j - pad)
            t = x[:, ext + delta:ext + delta + hw] if ext else x
            if pad and j != pad:
                t = t * m_ref[j:j + 1, :]
            taps.append(t)
    patches = taps[0] if len(taps) == 1 else jnp.concatenate(taps, axis=0)

    # Single MXU contraction, f32 accumulation.
    acc = jnp.dot(w_ref[...], patches,
                  preferred_element_type=jnp.float32)       # (Cout, H*W)
    y = acc + b_ref[...]                                    # folded BN bias
    if silu:
        y = y * jax.nn.sigmoid(y)                           # SiLU, f32 epilogue
    o_ref[0] = y.astype(o_ref.dtype)                        # lane-dense store


def conv_bn_silu(x_nchw, weight, gamma, beta, run_mean, run_var, *,
                 stride=1, padding=None, groups=1, dilation=1, eps=1e-5,
                 act=True, compute_dtype=jnp.float32):
    """Conv2d(no bias) + BatchNorm2d(eval) + SiLU, semantics of yolov5 Conv.

    x_nchw : (N, Cin, H, W)      float32
    weight : (Cout, Cin, KH, KW) float32  (PyTorch OIHW layout)
    returns: (N, Cout, Ho, Wo)   float32
    """
    n, cin, h, w = x_nchw.shape
    cout, cin_w, kh, kw = weight.shape
    if padding is None:
        padding = kh // 2                                   # autopad (d=1)
    ho = (h + 2 * padding - dilation * (kh - 1) - 1) // stride + 1
    wo = (w + 2 * padding - dilation * (kw - 1) - 1) // stride + 1

    # TODO(synk): only the stride=1 / groups=1 / dilation=1 'same' (autopad)
    # configuration is implemented; YOLOv5 stride-2 downsampling layers need a
    # space-to-depth (or strided-load) variant of the im2col below.
    if (stride != 1 or groups != 1 or dilation != 1 or cin_w != cin
            or kh != kw or ho != h or wo != w):
        raise NotImplementedError("conv_bn_silu: unsupported Conv configuration")

    hw = h * w
    f32 = jnp.float32

    # Fold BN (eval mode) into the conv: scale into the weights, bias on the side.
    scale = gamma.astype(f32) / jnp.sqrt(run_var.astype(f32) + eps)           # (Cout,)
    bias = (beta.astype(f32) - run_mean.astype(f32) * scale).reshape(cout, 1)
    # weights OIHW -> (Cout, KH*KW*Cin), K ordered (tap_i, tap_j, cin); tiny tensor.
    w_mat = jnp.transpose(weight.astype(f32), (0, 2, 3, 1)).reshape(cout, kh * kw * cin)
    w_mat = (w_mat * scale[:, None]).astype(compute_dtype)

    # Column-validity mask per horizontal tap offset (kills row-wrap lanes).
    col = jnp.arange(hw, dtype=jnp.int32) % w                                 # (H*W,)
    off = jnp.arange(kw, dtype=jnp.int32)[:, None] - padding                  # (KW, 1)
    mask = ((col[None, :] + off >= 0) & (col[None, :] + off < w)).astype(compute_dtype)

    # Free, layout-preserving reshape (minor-dims merge): stays NCHW, no transpose.
    x2d = x_nchw.reshape(n, cin, hw).astype(compute_dtype)

    # Zero-halo width, rounded up to 128 lanes so the in-kernel concat is aligned.
    ext = ((padding * w + padding + 127) // 128) * 128 if padding else 0

    kernel = functools.partial(_conv_bn_silu_kernel, kh=kh, kw=kw, pad=padding,
                               ext=ext, width=w, silu=bool(act))

    # TODO(synk): for real YOLOv5 feature maps on v7x (64 MiB VMEM) tile the
    # spatial axis (grid over output-row blocks with a halo) instead of one
    # full plane per grid step.
    out2d = pl.pallas_call(
        kernel,
        out_shape=jax.ShapeDtypeStruct((n, cout, hw), f32),
        grid_spec=pltpu.PrefetchScalarGridSpec(
            num_scalar_prefetch=0,
            grid=(n,),
            in_specs=[
                pl.BlockSpec((1, cin, hw), lambda b: (b, 0, 0)),
                pl.BlockSpec((cout, kh * kw * cin), lambda b: (0, 0)),
                pl.BlockSpec((cout, 1), lambda b: (0, 0)),
                pl.BlockSpec((kw, hw), lambda b: (0, 0)),
            ],
            out_specs=pl.BlockSpec((1, cout, hw), lambda b: (b, 0, 0)),
        ),
        compiler_params=pltpu.CompilerParams(
            dimension_semantics=("parallel",)),
    )(x2d, w_mat, bias, mask)

    return out2d.reshape(n, cout, ho, wo)   # free reshape back to (N, Cout, Ho, Wo)


def _reference(x_nchw, weight, gamma, beta, run_mean, run_var,
               *, stride=1, padding=1, eps=1e-5):
    y = jax.lax.conv_general_dilated(
        x_nchw, weight, window_strides=(stride, stride),
        padding=[(padding, padding), (padding, padding)],
        dimension_numbers=("NCHW", "OIHW", "NCHW"))
    scale = gamma / jnp.sqrt(run_var + eps)
    bias = beta - run_mean * scale
    y = y * scale[None, :, None, None] + bias[None, :, None, None]
    return y * jax.nn.sigmoid(y)


if __name__ == "__main__":
    # Conv(c1=4, c2=8, k=3, s=1) -> autopad p=1
    N, C1, H, W = 2, 4, 16, 16
    C2, K, S = 8, 3, 1
    P = K // 2

    key = jax.random.PRNGKey(0)
    kx, kw_, kg, kb, km, kv = jax.random.split(key, 6)

    x = jax.random.normal(kx, (N, C1, H, W), dtype=jnp.float32)
    weight = jax.random.normal(kw_, (C2, C1, K, K), dtype=jnp.float32) * 0.1
    gamma = jax.random.uniform(kg, (C2,), minval=0.5, maxval=1.5, dtype=jnp.float32)
    beta = jax.random.uniform(kb, (C2,), minval=-0.2, maxval=0.2, dtype=jnp.float32)
    run_mean = jax.random.normal(km, (C2,), dtype=jnp.float32) * 0.1
    run_var = jax.random.uniform(kv, (C2,), minval=0.5, maxval=1.5, dtype=jnp.float32)

    conv_fn = jax.jit(functools.partial(conv_bn_silu, stride=S, padding=P))
    out = jax.block_until_ready(conv_fn(x, weight, gamma, beta, run_mean, run_var))

    ref = _reference(x, weight, gamma, beta, run_mean, run_var, stride=S, padding=P)
    assert out.shape == (N, C2, H, W)
    assert jnp.allclose(out, ref, atol=1e-4, rtol=1e-4), \
        float(jnp.max(jnp.abs(out - ref)))

    print("KERNEL_OK")
</pallas_src>

<mosaic_0001>
module attributes {stable_mosaic.version = 11 : i64} {
  func.func @_conv_bn_silu_kernel(%arg0: i32, %arg1: memref<1x4x256xf32, #tpu.memory_space<vmem>>, %arg2: memref<8x36xf32, #tpu.memory_space<vmem>>, %arg3: memref<8x1xf32, #tpu.memory_space<vmem>>, %arg4: memref<3x256xf32, #tpu.memory_space<vmem>>, %arg5: memref<1x8x256xf32, #tpu.memory_space<vmem>>) attributes {dimension_semantics = [#tpu.dimension_semantics<parallel>], iteration_bounds = array<i64: 2>, scalar_prefetch = 0 : i64, scratch_operands = 0 : i64, tpu.core_type = #tpu.core_type<tc>, window_params = [{transform_indices = @transform_0, window_bounds = array<i64: 1, 4, 256>}, {pipeline_mode = #tpu.pipeline_mode<synchronous>, transform_indices = @transform_1, window_bounds = array<i64: 8, 36>}, {pipeline_mode = #tpu.pipeline_mode<synchronous>, transform_indices = @transform_2, window_bounds = array<i64: 8, 1>}, {pipeline_mode = #tpu.pipeline_mode<synchronous>, transform_indices = @transform_3, window_bounds = array<i64: 3, 256>}, {transform_indices = @transform_4, window_bounds = array<i64: 1, 8, 256>}]} {
    %c0 = arith.constant 0 : index
    %c0_0 = arith.constant 0 : index
    %c0_1 = arith.constant 0 : index
    %0 = vector.load %arg1[%c0, %c0_0, %c0_1] : memref<1x4x256xf32, #tpu.memory_space<vmem>>, vector<1x4x256xf32>
    %1 = vector.shape_cast %0 : vector<1x4x256xf32> to vector<4x256xf32>
    %cst = arith.constant 0.000000e+00 : f32
    %2 = vector.broadcast %cst : f32 to vector<4x128xf32>
    %3 = tpu.concatenate %2, %1, %2 in 1 : vector<4x128xf32>, vector<4x256xf32>, vector<4x128xf32> -> vector<4x512xf32>
    %4 = vector.extract_strided_slice %3 {offsets = [0, 111], sizes = [4, 256], strides = [1, 1]} : vector<4x512xf32> to vector<4x256xf32>
    %c0_2 = arith.constant 0 : index
    %c0_3 = arith.constant 0 : index
    %5 = vector.load %arg4[%c0_2, %c0_3] : memref<3x256xf32, #tpu.memory_space<vmem>>, vector<1x256xf32>
    %6 = vector.broadcast %5 : vector<1x256xf32> to vector<4x256xf32>
    %7 = arith.mulf %4, %6 : vector<4x256xf32>
    %8 = vector.extract_strided_slice %3 {offsets = [0, 112], sizes = [4, 256], strides = [1, 1]} : vector<4x512xf32> to vector<4x256xf32>
    %9 = vector.extract_strided_slice %3 {offsets = [0, 113], sizes = [4, 256], strides = [1, 1]} : vector<4x512xf32> to vector<4x256xf32>
    %c2 = arith.constant 2 : index
    %c0_4 = arith.constant 0 : index
    %10 = vector.load %arg4[%c2, %c0_4] : memref<3x256xf32, #tpu.memory_space<vmem>>, vector<1x256xf32>
    %11 = vector.broadcast %10 : vector<1x256xf32> to vector<4x256xf32>
    %12 = arith.mulf %9, %11 : vector<4x256xf32>
    %13 = vector.extract_strided_slice %3 {offsets = [0, 127], sizes = [4, 256], strides = [1, 1]} : vector<4x512xf32> to vector<4x256xf32>
    %c0_5 = arith.constant 0 : index
    %c0_6 = arith.constant 0 : index
    %14 = vector.load %arg4[%c0_5, %c0_6] : memref<3x256xf32, #tpu.memory_space<vmem>>, vector<1x256xf32>
    %15 = vector.broadcast %14 : vector<1x256xf32> to vector<4x256xf32>
    %16 = arith.mulf %13, %15 : vector<4x256xf32>
    %17 = vector.extract_strided_slice %3 {offsets = [0, 128], sizes = [4, 256], strides = [1, 1]} : vector<4x512xf32> to vector<4x256xf32>
    %18 = vector.extract_strided_slice %3 {offsets = [0, 129], sizes = [4, 256], strides = [1, 1]} : vector<4x512xf32> to vector<4x256xf32>
    %c2_7 = arith.constant 2 : index
    %c0_8 = arith.constant 0 : index
    %19 = vector.load %arg4[%c2_7, %c0_8] : memref<3x256xf32, #tpu.memory_space<vmem>>, vector<1x256xf32>
    %20 = vector.broadcast %19 : vector<1x256xf32> to vector<4x256xf32>
    %21 = arith.mulf %18, %20 : vector<4x256xf32>
    %22 = vector.extract_strided_slice %3 {offsets = [0, 143], sizes = [4, 256], strides = [1, 1]} : vector<4x512xf32> to vector<4x256xf32>
    %c0_9 = arith.constant 0 : index
    %c0_10 = arith.constant 0 : index
    %23 = vector.load %arg4[%c0_9, %c0_10] : memref<3x256xf32, #tpu.memory_space<vmem>>, vector<1x256xf32>
    %24 = vector.broadcast %23 : vector<1x256xf32> to vector<4x256xf32>
    %25 = arith.mulf %22, %24 : vector<4x256xf32>
    %26 = vector.extract_strided_slice %3 {offsets = [0, 144], sizes = [4, 256], strides = [1, 1]} : vector<4x512xf32> to vector<4x256xf32>
    %27 = vector.extract_strided_slice %3 {offsets = [0, 145], sizes = [4, 256], strides = [1, 1]} : vector<4x512xf32> to vector<4x256xf32>
    %c2_11 = arith.constant 2 : index
    %c0_12 = arith.constant 0 : index
    %28 = vector.load %arg4[%c2_11, %c0_12] : memref<3x256xf32, #tpu.memory_space<vmem>>, vector<1x256xf32>
    %29 = vector.broadcast %28 : vector<1x256xf32> to vector<4x256xf32>
    %30 = arith.mulf %27, %29 : vector<4x256xf32>
    %31 = tpu.concatenate %7, %8, %12, %16, %17, %21, %25, %26, %30 in 0 : vector<4x256xf32>, vector<4x256xf32>, vector<4x256xf32>, vector<4x256xf32>, vector<4x256xf32>, vector<4x256xf32>, vector<4x256xf32>, vector<4x256xf32>, vector<4x256xf32> -> vector<36x256xf32>
    %c0_13 = arith.constant 0 : index
    %c0_14 = arith.constant 0 : index
    %32 = vector.load %arg2[%c0_13, %c0_14] : memref<8x36xf32, #tpu.memory_space<vmem>>, vector<8x36xf32>
    %cst_15 = arith.constant dense<0.000000e+00> : vector<8x256xf32>
    %33 = tpu.matmul %32, %31, %cst_15 {dimension_numbers = #tpu.dot_dimension_numbers<[1], [0], [0], [1], [0, 0, 1, 1], [], []>} : vector<8x36xf32>, vector<36x256xf32>, vector<8x256xf32> -> vector<8x256xf32>
    %c0_16 = arith.constant 0 : index
    %c0_17 = arith.constant 0 : index
    %34 = vector.load %arg3[%c0_16, %c0_17] : memref<8x1xf32, #tpu.memory_space<vmem>>, vector<8x1xf32>
    %35 = vector.broadcast %34 : vector<8x1xf32> to vector<8x256xf32>
    %36 = arith.addf %33, %35 : vector<8x256xf32>
    %37 = arith.negf %36 : vector<8x256xf32>
    %38 = math.exp %37 : vector<8x256xf32>
    %cst_18 = arith.constant 1.000000e+00 : f32
    %39 = vector.broadcast %cst_18 : f32 to vector<8x256xf32>
    %40 = arith.addf %39, %38 : vector<8x256xf32>
    %41 = arith.divf %39, %40 : vector<8x256xf32>
    %42 = arith.mulf %36, %41 : vector<8x256xf32>
    %c0_19 = arith.constant 0 : index
    %c0_20 = arith.constant 0 : index
    %c0_21 = arith.constant 0 : index
    %43 = vector.load %arg5[%c0_19, %c0_20, %c0_21] : memref<1x8x256xf32, #tpu.memory_space<vmem>>, vector<1x8x256xf32>
    %44 = vector.shape_cast %43 : vector<1x8x256xf32> to vector<8x256xf32>
    %45 = vector.shape_cast %42 : vector<8x256xf32> to vector<1x8x256xf32>
    tpu.vector_store %arg5[%c0_19, %c0_20, %c0_21], %45 {strides = array<i32>} : memref<1x8x256xf32, #tpu.memory_space<vmem>>, vector<1x8x256xf32>,
    return
  }
  func.func @transform_0(%arg0: i32) -> (i32, i32, i32) {
    %c0_i32 = arith.constant 0 : i32
    %c0_i32_0 = arith.constant 0 : i32
    %c0_i32_1 = arith.constant 0 : i32
    return %arg0, %c0_i32, %c0_i32_0 : i32, i32, i32
  }
  func.func @transform_1(%arg0: i32) -> (i32, i32) {
    %c0_i32 = arith.constant 0 : i32
    %c0_i32_0 = arith.constant 0 : i32
    %c0_i32_1 = arith.constant 0 : i32
    return %c0_i32, %c0_i32_0 : i32, i32
  }
  func.func @transform_2(%arg0: i32) -> (i32, i32) {
    %c0_i32 = arith.constant 0 : i32
    %c0_i32_0 = arith.constant 0 : i32
    %c0_i32_1 = arith.constant 0 : i32
    return %c0_i32, %c0_i32_0 : i32, i32
  }
  func.func @transform_3(%arg0: i32) -> (i32, i32) {
    %c0_i32 = arith.constant 0 : i32
    %c0_i32_0 = arith.constant 0 : i32
    %c0_i32_1 = arith.constant 0 : i32
    return %c0_i32, %c0_i32_0 : i32, i32
  }
  func.func @transform_4(%arg0: i32) -> (i32, i32, i32) {
    %c0_i32 = arith.constant 0 : i32
    %c0_i32_0 = arith.constant 0 : i32
    %c0_i32_1 = arith.constant 0 : i32
    return %arg0, %c0_i32, %c0_i32_0 : i32, i32, i32
  }
}

</mosaic_0001>

<bundles_post_ra>
// kernel: conv_bn_silu.1
= control target key start
LH: loop header
LB: loop body
LE: loop exit
PB: predicated region body
PF: predicated region fallthrough
CT: control target
= control target key end

     0   :  { %s736_s15 = smov 0   ;;  %s863_s0 = inlined_call_operand.vmem [shape: f32[2,4,256], index: 0, kind: input, shape index: {}]   ;;  %s864_s1 = inlined_call_operand.vmem [shape: f32[8,36], index: 1, kind: input, shape index: {}]   ;;  %s865_s2 = inlined_call_operand.vmem [shape: f32[8,1], index: 2, kind: input, shape index: {}]   ;;  %s866_s3 = inlined_call_operand.vmem [shape: f32[3,256], index: 3, kind: input, shape index: {}]   ;;  %s867_s4 = inlined_call_operand.vmem [shape: f32[2,8,256], index: 4, kind: output, shape index: {}]  }
   0x1 LB: > { %s638_s16 = sadd.s32 4294967295, %s695_s15   ;;  %p642_p0 = scmp.ge.s32.totalorder %s695_s15, 1  ;;  %s695_s15 = sphi %s736_s15, %s14_s15  }
   0x2   : > { %p162_p1 = scmp.lt.s32.totalorder %s695_s15, 3 }
   0x4   : > { %p163_p2 = pnand %p642_p0, %p162_p1 }
   0x5   : > { %p188_p3 = scmp.lt.s32.totalorder (!%p163_p2), %s638_s16, 1  ;;  %s698_s19 = smov (!%p163_p2), 1  }
   0x6   : > { %166 = sbr.rel (%p163_p2) target bundleno = 646 (0x286), region = 36  ;;  %s699_s20 = smov (!%p163_p2), 17  }
   0x7   : > { %s700_s24 = smov (!%p163_p2), 15   ;;  %s701_s28 = smov (!%p163_p2), 127  }
   0x8   : > { %s702_s29 = smov (!%p163_p2), 113   ;;  %s703_s30 = smov (!%p163_p2), 95  }
   0x9   : > { %s704_s5 = smov (!%p163_p2), 111   ;;  %s705_s6 = smov (!%p163_p2), 94  }
   0xa   : > { %s706_s7 = smov (!%p163_p2), 96   ;;  %s707_s8 = smov (!%p163_p2), 126  }
   0xb   : > { %v204_v0 = vlaneseq  ;;  %v697_v1 = vmov 0.0   ;;  %v647_v3 = vld [vmem:[%s866_s3 + $0x2] ss:$4 sm:$0x3]  ;;  %s869_s16 = smov (!%p188_p3, %s638_s16), 1  ;;  %vm287_vm0 = vcmask 138240  }
   0xc   : > { %560 = vmatprep.mubr.f32.mxu0 %v697_v1  ;;  %v202_v8 = vld [vmem:[%s866_s3] ss:$4 sm:$0x3]  ;;  %s655_s23 = sshll.u32 %s869_s16, 3  ;;  %v767_v14 = vrot.slane %v697_v1, 4  ;;  %vm275_vm1 = vcmask 121856  }
   0xd   : > { %v205_v2 = vshrl.u32 %v204_v0, 7  ;;  %s192_s27 = scalar_lea.vmem %s863_s0, %s655_s23  ;;  %vm263_vm2 = vcmask 7168   ;;  %vm239_vm3 = vcmask 924672   ;;  %vm251_vm4 = vcmask 1039360   ;;  %s708_s9 = smov 110  }
   0xe   : > { %v760_v11 = vld [vmem:[%s192_s27] sm:$0xff]  ;;  %s709_s10 = smov 112   ;;  %vm408_vm5 = vcmask 1043456   ;;  %vm405_vm6 = vcmask 769024   ;;  %vm378_vm7 = vcmask 785408   ;;  %vm390_vm8 = vcmask 777216  }
   0xf   : > { %v206_v4 = vsub.s32 0, %v205_v2  ;;  %v210_v5 = vsub.s32 1, %v205_v2  ;;  %v297_v12 = vrot.slane %v760_v11, 4  ;;  %v765_v13 = vcombine.high %v760_v11, %v760_v11  ;;  %s656_s17 = sshll.u32 %s869_s16, 4 }
  0x10   : > { %vm363_vm9 = vcmask 900096   ;;  %vm319_vm10 = vcmask 1031168   ;;  %vm337_vm11 = vcmask 916480   ;;  %vm216_vm12 = vcmask 908288  }
  0x11   : > { %v230_v6 = vrot.slane %v647_v3, %v206_v4  ;;  %v234_v7 = vrot.slane %v647_v3, %v210_v5  ;;  %v211_v9 = vrot.slane %v202_v8, %v210_v5  ;;  %v207_v10 = vrot.slane %v202_v8, %v206_v4 }
  0x12   : > { %vm488_vm13 = vcmask 293888  }
  0x13   : > { %259 = vrot.lane.b32.xlu1 %v230_v6, %s698_s19  ;;  %283 = vrot.lane.b32.xlu0 %v230_v6, %s699_s20 }
  0x17   : > { %261 = vrot.lane.b32.xlu1 %v234_v7, %s698_s19  ;;  %285 = vrot.lane.b32.xlu0 %v234_v7, %s699_s20 }
  0x1b   : > { %273 = vrot.lane.b32.xlu1 %v211_v9, %s700_s24  ;;  %271 = vrot.lane.b32.xlu0 %v207_v10, %s700_s24 }
  0x1f   : > { %249 = vrot.lane.b32.xlu1 %v211_v9, %s701_s28  ;;  %247 = vrot.lane.b32.xlu0 %v207_v10, %s701_s28 }
  0x23   : > { %237 = vrot.lane.b32.xlu1 %v234_v7, %s702_s29  ;;  %235 = vrot.lane.b32.xlu0 %v230_v6, %s702_s29 }
  0x27   : > { %384 = vrot.lane.b32.xlu0 %v297_v12, %s703_s30  ;;  %386 = vrot.lane.b32.xlu1 %v765_v13, %s703_s30 }
  0x2b   : > { %388 = vrot.lane.b32.xlu0 %v767_v14, %s703_s30  ;;  %343 = vrot.lane.b32.xlu1 %v760_v11, %s704_s5 }
  0x2f   : > { %345 = vrot.lane.b32.xlu0 %v765_v13, %s704_s5  ;;  %214 = vrot.lane.b32.xlu1 %v211_v9, %s704_s5 }
  0x33   : > { %212 = vrot.lane.b32.xlu0 %v207_v10, %s704_s5 }
  0x37   : > { %301 = vrot.lane.b32.xlu0 %v297_v12, %s701_s28 }
  0x85   : > { %v260_v15 = vpop.permute.xlu1 %259  ;;  %v284_v16 = vpop.permute.xlu0 %283 }
  0x86   : > { %v292_v17 = vmul.f32 %v284_v16, %v760_v11  ;;  %v268_v33 = vmul.f32 %v260_v15, %v760_v11 }
  0x88   : > { %399 = vrot.lane.b32.xlu0 %v292_v17, %s705_s6  ;;  %v354_v38 = vrot.slane %v268_v33, 4 }
  0x89   : > { %v262_v18 = vpop.permute.xlu1 %261  ;;  %v286_v19 = vpop.permute.xlu0 %285 }
  0x8a   : > { %v294_v20 = vmul.f32 0.0, %v286_v19  ;;  %v288_v31 = vsel %vm287_vm0, %v284_v16, %v286_v19  ;;  %v264_v36 = vsel %vm263_vm2, %v260_v15, %v262_v18  ;;  %v270_v40 = vmul.f32 0.0, %v262_v18 }
  0x8b   : > { %v293_v34 = vmul.f32 %v288_v31, %v765_v13  ;;  %v269_v39 = vmul.f32 %v264_v36, %v765_v13 }
  0x8c   : > { %403 = vrot.lane.b32.xlu0 %v294_v20, %s705_s6  ;;  %v356_v44 = vrot.slane %v270_v40, 4 }
  0x8d   : > { %v274_v21 = vpop.permute.xlu1 %273  ;;  %v272_v22 = vpop.permute.xlu0 %271  ;;  %v355_v43 = vrot.slane %v269_v39, 4 }
  0x8e   : > { %v280_v23 = vmul.f32 %v272_v22, %v760_v11  ;;  %v282_v26 = vmul.f32 0.0, %v274_v21  ;;  %v276_v32 = vsel %vm275_vm1, %v272_v22, %v274_v21 }
  0x8f   : > { %v281_v35 = vmul.f32 %v276_v32, %v765_v13 }
  0x90   : > { %372 = vrot.lane.b32.xlu1 %v280_v23, %s706_s7 }
  0x91   : > { %v250_v24 = vpop.permute.xlu1 %249  ;;  %v248_v25 = vpop.permute.xlu0 %247 }
  0x92   : > { %v252_v42 = vsel %vm251_vm4, %v248_v25, %v250_v24  ;;  %v258_v45 = vmul.f32 %v250_v24, %v765_v13  ;;  %v256_v48 = vmul.f32 0.0, %v248_v25 }
  0x93   : > { %v257_v46 = vmul.f32 %v252_v42, %v760_v11 }
  0x94   : > { %376 = vrot.lane.b32.xlu1 %v282_v26, %s706_s7  ;;  %v330_v47 = vrot.slane %v258_v45, 4  ;;  %v328_v50 = vrot.slane %v256_v48, 4 }
  0x95   : > { %v238_v27 = vpop.permute.xlu1 %237  ;;  %v236_v28 = vpop.permute.xlu0 %235  ;;  %v329_v49 = vrot.slane %v257_v46, 4 }
  0x96   : > { %v246_v29 = vmul.f32 %v238_v27, %v765_v13  ;;  %v244_v30 = vmul.f32 0.0, %v236_v28  ;;  %v240_v37 = vsel %vm239_vm3, %v236_v28, %v238_v27 }
  0x97   : > { %v245_v41 = vmul.f32 %v240_v37, %v760_v11 }
  0x98   : > { %313 = vrot.lane.b32.xlu0 %v244_v30, %s707_s8  ;;  %317 = vrot.lane.b32.xlu1 %v246_v29, %s707_s8 }
  0x99   : > { %v385_v51 = vpop.permute.xlu0 %384  ;;  %v387_v55 = vpop.permute.xlu1 %386 }
  0x9a   : > { %v391_v8 = vsel %vm390_vm8, %v385_v51, %v387_v55 }
  0x9c   : > { %374 = vrot.lane.b32.xlu0 %v281_v35, %s706_s7  ;;  %401 = vrot.lane.b32.xlu1 %v293_v34, %s705_s6  ;;  %v710_v34 = vmov 0  }
  0x9d   : > { %v389_v52 = vpop.permute.xlu0 %388  ;;  %v344_v57 = vpop.permute.xlu1 %343  ;;  %679 = vset.pattern.permute.xlu0 %v710_v34 }
  0x9e   : > { %v392_v9 = vsel %vm390_vm8, %v387_v55, %v389_v52 }
  0xa0   : > { %315 = vrot.lane.b32.xlu0 %v245_v41, %s707_s8  ;;  %357 = vrot.lane.b32.xlu1 %v354_v38, %s708_s9 }
  0xa1   : > { %v346_v53 = vpop.permute.xlu0 %345  ;;  %v215_v59 = vpop.permute.xlu1 %214 }
  0xa2   : > { %v347_v28 = vsel %vm216_vm12, %v344_v57, %v346_v53  ;;  %v223_v36 = vmul.f32 %v215_v59, %v765_v13 }
  0xa4   : > { %359 = vrot.lane.b32.xlu0 %v355_v43, %s708_s9  ;;  %361 = vrot.lane.b32.xlu1 %v356_v44, %s708_s9 }
  0xa5   : > { %v793_v54 = vpop.permute.xlu0 %212 }
  0xa6   : > { %v217_v30 = vsel %vm216_vm12, %v793_v54, %v215_v59 }
  0xa7   : > { %v222_v37 = vmul.f32 %v217_v30, %v760_v11  ;;  %v422_v11 = vld [vmem:[%s865_s2] sm:$0xff] }
  0xa8   : > { %333 = vrot.lane.b32.xlu0 %v329_v49, %s709_s10  ;;  %335 = vrot.lane.b32.xlu1 %v330_v47, %s709_s10 }
  0xa9   : > { %v795_v56 = vpop.permute.xlu0 %301 }
  0xac   : > { %299 = vrot.lane.b32.xlu0 %v767_v14, %s701_s28  ;;  %331 = vrot.lane.b32.xlu1 %v328_v50, %s709_s10 }
  0xb0   : > { %303 = vrot.lane.b32.xlu1 %v765_v13, %s701_s28  ;;  %v221_v13 = vmul.f32 0.0, %v793_v54 }
  0xfa   : > { %v400_v58 = vpop.permute.xlu0 %399 }
  0xfb   : > { %464 = vrot.lane.b32.xlu1 %v400_v58, %s699_s20 }
  0xfe   : > { %v404_v62 = vpop.permute.xlu0 %403 }
 0x102   : > { %v373_v60 = vpop.permute.xlu1 %372 }
 0x103   : > { %v418_v61 = vsel %vm408_vm5, %v373_v60, %v385_v51 }
 0x104   : > { %458 = vrot.lane.b32.xlu0 %v418_v61, %s699_s20 }
 0x106   : > { %v377_v63 = vpop.permute.xlu1 %376 }
 0x10a   : > { %v314_v0 = vpop.permute.xlu0 %313  ;;  %v318_v1 = vpop.permute.xlu1 %317 }
 0x10e   : > { %v375_v2 = vpop.permute.xlu0 %374  ;;  %v402_v3 = vpop.permute.xlu1 %401 }
 0x10f   : > { %v407_v4 = vsel %vm405_vm6, %v402_v3, %v404_v62  ;;  %v406_v5 = vsel %vm405_vm6, %v400_v58, %v402_v3  ;;  %v379_v6 = vsel %vm378_vm7, %v373_v60, %v375_v2  ;;  %v380_v7 = vsel %vm378_vm7, %v375_v2, %v377_v63 }
 0x110   : > { %468 = vrot.lane.b32.xlu0 %v407_v4, %s699_s20  ;;  %466 = vrot.lane.b32.xlu1 %v406_v5, %s699_s20  ;;  %v419_v14 = vsel %vm408_vm5, %v379_v6, %v391_v8  ;;  %v420_v15 = vsel %vm408_vm5, %v380_v7, %v392_v9  ;;  %v421_v5 = vld [vmem:[%s864_s1] sm:$0xff] }
 0x112   : > { %v316_v10 = vpop.permute.xlu0 %315  ;;  %v358_v12 = vpop.permute.xlu1 %357 }
 0x113   : > { %v415_v19 = vsel %vm408_vm5, %v344_v57, %v358_v12  ;;  %v321_v23 = vsel %vm319_vm10, %v316_v10, %v318_v1  ;;  %v320_v31 = vsel %vm319_vm10, %v314_v0, %v316_v10 }
 0x114   : > { %460 = vrot.lane.b32.xlu0 %v419_v14, %s699_s20  ;;  %462 = vrot.lane.b32.xlu1 %v420_v15, %s699_s20 }
 0x116   : > { %v360_v16 = vpop.permute.xlu0 %359  ;;  %v362_v17 = vpop.permute.xlu1 %361 }
 0x117   : > { %v365_v18 = vsel %vm363_vm9, %v360_v16, %v362_v17  ;;  %v364_v26 = vsel %vm363_vm9, %v358_v12, %v360_v16 }
 0x118   : > { %452 = vrot.lane.b32.xlu1 %v415_v19, %s699_s20  ;;  %v417_v20 = vsel %vm408_vm5, %v346_v53, %v365_v18  ;;  %v416_v33 = vsel %vm408_vm5, %v347_v28, %v364_v26 }
 0x119   : > { %456 = vrot.lane.b32.xlu0 %v417_v20, %s699_s20 }
 0x11a   : > { %v334_v21 = vpop.permute.xlu0 %333  ;;  %v336_v22 = vpop.permute.xlu1 %335 }
 0x11b   : > { %v339_v24 = vsel %vm337_vm11, %v334_v21, %v336_v22  ;;  %v414_v25 = vsel %vm408_vm5, %v318_v1, %v336_v22 }
 0x11c   : > { %450 = vrot.lane.b32.xlu1 %v414_v25, %s699_s20  ;;  %v413_v27 = vsel %vm408_vm5, %v321_v23, %v339_v24 }
 0x11d   : > { %448 = vrot.lane.b32.xlu0 %v413_v27, %s699_s20 }
 0x11e   : > { %v332_v29 = vpop.permute.xlu1 %331  ;;  %v300_v38 = vpop.permute.xlu0 %299 }
 0x11f   : > { %v338_v32 = vsel %vm337_vm11, %v332_v29, %v334_v21  ;;  %v305_v43 = vsel %vm251_vm4, %v300_v38, %v795_v56 }
 0x120   : > { %454 = vrot.lane.b32.xlu1 %v416_v33, %s699_s20  ;;  %v412_v35 = vsel %vm408_vm5, %v320_v31, %v338_v32  ;;  %v409_v44 = vsel %vm408_vm5, %v221_v13, %v305_v43 }
 0x121   : > { %446 = vrot.lane.b32.xlu0 %v412_v35, %s699_s20 }
 0x122   : > { %v304_v39 = vpop.permute.xlu1 %303 }
 0x123   : > { %v306_v40 = vsel %vm251_vm4, %v795_v56, %v304_v39  ;;  %v411_v41 = vsel %vm408_vm5, %v223_v36, %v304_v39 }
 0x124   : > { %v410_v42 = vsel %vm408_vm5, %v222_v37, %v306_v40 }
 0x125   : > { %444 = vrot.lane.b32.xlu0 %v411_v41, %s699_s20  ;;  %442 = vrot.lane.b32.xlu1 %v410_v42, %s699_s20 }
 0x129   : > { %440 = vrot.lane.b32.xlu1 %v409_v44, %s699_s20  ;;  %425 = vperm.xlu0 %679, %v422_v11   ;;  %s197_s20 = scalar_lea.vmem %s867_s4, %s656_s17 }
 0x16d   : > { %v465_v45 = vpop.permute.xlu1 %464 }
 0x176   : > { %v459_v46 = vpop.permute.xlu0 %458 }
 0x182   : > { %v469_v47 = vpop.permute.xlu0 %468  ;;  %v467_v48 = vpop.permute.xlu1 %466 }
 0x183   : > { %v479_v49 = vsel %vm287_vm0, %v467_v48, %v469_v47  ;;  %v478_v50 = vsel %vm287_vm0, %v465_v45, %v467_v48 }
 0x184   : > { %648 = vmatprep.subr.msk.mxu0 %vm408_vm5, %v479_v49 }
 0x185   : > { %649 = vmatpush1.msk.msra.mxu0 %vm408_vm5, %v478_v50 }
 0x186   : > { %v461_v51 = vpop.permute.xlu0 %460  ;;  %v463_v52 = vpop.permute.xlu1 %462 }
 0x187   : > { %v477_v53 = vsel %vm287_vm0, %v461_v51, %v463_v52  ;;  %v476_v54 = vsel %vm287_vm0, %v459_v46, %v461_v51 }
 0x188   : > { %520 = vmatprep.subr.mxu0 %v477_v53 }
 0x189   : > { %521 = vmatpush1.msra.mxu0 %v476_v54 }
 0x18a   : > { %v453_v55 = vpop.permute.xlu1 %452 }
 0x18b   : > { %v457_v56 = vpop.permute.xlu0 %456 }
 0x18e   : > { %v451_v57 = vpop.permute.xlu1 %450 }
 0x18f   : > { %v449_v58 = vpop.permute.xlu0 %448 }
 0x190   : > { %v473_v63 = vsel %vm287_vm0, %v449_v58, %v451_v57 }
 0x192   : > { %v455_v59 = vpop.permute.xlu1 %454 }
 0x193   : > { %v447_v60 = vpop.permute.xlu0 %446  ;;  %v475_v61 = vsel %vm287_vm0, %v455_v59, %v457_v56  ;;  %v474_v62 = vsel %vm287_vm0, %v453_v55, %v455_v59 }
 0x194   : > { %522 = vmatprep.subr.mxu0 %v475_v61  ;;  %v472_v0 = vsel %vm287_vm0, %v447_v60, %v449_v58 }
 0x195   : > { %523 = vmatpush1.msra.mxu0 %v474_v62 }
 0x196   : > { %524 = vmatprep.subr.mxu0 %v473_v63 }
 0x197   : > { %v445_v1 = vpop.permute.xlu0 %444  ;;  %525 = vmatpush1.msra.mxu0 %v472_v0  ;;  %v443_v2 = vpop.permute.xlu1 %442 }
 0x198   : > { %v471_v3 = vsel %vm287_vm0, %v443_v2, %v445_v1 }
 0x199   : > { %526 = vmatprep.subr.mxu0 %v471_v3 }
 0x19b   : > { %v441_v4 = vpop.permute.xlu1 %440 }
 0x19c   : > { %v470_v6 = vsel %vm287_vm0, %v441_v4, %v443_v2 }
 0x19d   : > { %527 = vmatpush1.msra.mxu0 %v470_v6 }
 0x19e   : > { %650 = vmatmul.mubr.msk.f32.vlgmr.msra.gmra.mxu0 %vm488_vm13, %v421_v5 }
 0x1a4   : > { %v426_v7 = vpop.permute.xlu0 %425 }
 0x25e   : > { %v562_v8 = vpop.f32.mrf.mxu0 }
 0x25f   : > { %v563_v9 = vadd.f32 %v562_v8, %v426_v7 }
 0x260   : > { %v564_v10 = vpop.f32.mrf.mxu0 }
 0x261   : > { %v651_v12 = vmul.f32 -1.442695, %v563_v9  ;;  %v565_v14 = vadd.f32 %v564_v10, %v426_v7 }
 0x263   : > { %681 = vpow2.f32 %v651_v12  ;;  %v652_v15 = vmul.f32 -1.442695, %v565_v14 }
 0x265   : > { %683 = vpow2.f32 %v652_v15 }
 0x270   : > { %v682_v16 = vpop.eup %681 }
 0x271   : > { %v573_v17 = vadd.f32 1.0, %v682_v16 }
 0x272   : > { %v684_v18 = vpop.eup %683 }
 0x273   : > { %685 = vrcp.f32 %v573_v17  ;;  %v574_v19 = vadd.f32 1.0, %v684_v18 }
 0x275   : > { %687 = vrcp.f32 %v574_v19 }
 0x280   : > { %v686_v20 = vpop.eup %685 }
 0x281   : > { %v579_v21 = vmul.f32 %v686_v20, %v563_v9 }
 0x282   : > { %v688_v22 = vpop.eup %687 }
 0x283   : > { %581 = vst [vmem:[%s197_s20] sm:$0xff] %v579_v21  ;;  %v580_v23 = vmul.f32 %v688_v22, %v565_v14 }
 0x285   : > { %582 = vst [vmem:[%s197_s20 + $0x8] sm:$0xff] %v580_v23 }
 0x286 PF: > { %s14_s15 = sadd.s32 1, %s695_s15  }
 0x287   : > { %p11_p4 = scmp.ge.s32.totalorder %s14_s15, 4  }
 0x289   :  { %13 = sbr.rel (!%p11_p4) target bundleno = 1 (0x1), region = 67 }

</bundles_post_ra>
